<compile_context>
chip_gen: v7x
topology: tpu7x:2x2x1
jax: 0.10.0
libtpu: 0.0.40
codegen_flags: <defaults>
</compile_context>

<pallas_src>
import functools

import jax
import jax.numpy as jnp
from jax.experimental import pallas as pl
from jax.experimental.pallas import tpu as pltpu

LANE_WIDTH = 512        # slab width (multiple of 128 -> unmasked lane-dense stores)
MAX_TILE_ROWS = 512     # 512 x 512 x 4B = 1 MiB f32 block


def _gaussian_noise_kernel(x_ref, b1_ref, b2_ref, o_ref, *, sigma):
    # Uniform (0, 1) from 23 random bits (int32 bits, already sign-safe after mask).
    inv23 = jnp.float32(1.0 / (1 << 23))
    u1 = (jnp.bitwise_and(b1_ref[...], 0x7FFFFF).astype(jnp.float32) + 0.5) * inv23
    u2 = (jnp.bitwise_and(b2_ref[...], 0x7FFFFF).astype(jnp.float32) + 0.5) * inv23

    # Box-Muller: use BOTH outputs so each (u1, u2) pair yields two normals.
    r = jnp.sqrt(jnp.float32(-2.0) * jnp.log(u1))
    theta = jnp.float32(2.0 * jnp.pi) * u2
    z = jnp.concatenate([r * jnp.cos(theta), r * jnp.sin(theta)], axis=-1)

    noisy = x_ref[...].astype(jnp.float32) + jnp.float32(sigma) * z
    o_ref[...] = jnp.clip(noisy, 0.0, 1.0).astype(o_ref.dtype)


def gaussian_noise(img, sigma, key, lane_width=LANE_WIDTH, max_tile_rows=MAX_TILE_ROWS):
    """clip(img + N(0, sigma), 0, 1). `img` is a float array (e.g. NCHW).

    Note: integer dtypes are not supported (clipping to [0,1] only makes sense
    for float images), matching the PyTorch module's implicit assumption.
    """
    orig_shape = img.shape
    orig_dtype = img.dtype

    n = 1
    for d in orig_shape:
        n *= int(d)

    # --- choose slab / tiling -------------------------------------------------
    rows = pl.cdiv(n, lane_width)
    if rows <= max_tile_rows:
        # Single block covering the whole slab (block == full array dims is legal
        # even when rows is not a multiple of 8).
        tile_rows = max(rows, 1)
        rows_padded = tile_rows
    else:
        tile_rows = max_tile_rows          # multiple of 8
        rows_padded = pl.cdiv(rows, tile_rows) * tile_rows
    n_padded = rows_padded * lane_width

    # --- build inputs (skip pad when already divisible) ------------------------
    flat = img.reshape(-1)
    if n_padded != n:
        flat = jnp.pad(flat, (0, n_padded - n))
    x2d = flat.reshape(rows_padded, lane_width)

    half = lane_width // 2
    k1, k2 = jax.random.split(key)
    bits1 = jax.lax.bitcast_convert_type(
        jax.random.bits(k1, (rows_padded, half), dtype=jnp.uint32), jnp.int32)
    bits2 = jax.lax.bitcast_convert_type(
        jax.random.bits(k2, (rows_padded, half), dtype=jnp.uint32), jnp.int32)

    grid = (rows_padded // tile_rows,)

    out2d = pl.pallas_call(
        functools.partial(_gaussian_noise_kernel, sigma=float(sigma)),
        out_shape=jax.ShapeDtypeStruct((rows_padded, lane_width), x2d.dtype),
        grid=grid,
        in_specs=[
            pl.BlockSpec((tile_rows, lane_width), lambda i: (i, 0)),
            pl.BlockSpec((tile_rows, half), lambda i: (i, 0)),
            pl.BlockSpec((tile_rows, half), lambda i: (i, 0)),
        ],
        out_specs=pl.BlockSpec((tile_rows, lane_width), lambda i: (i, 0)),
        compiler_params=pltpu.CompilerParams(
            dimension_semantics=("parallel",),      # independent tiles -> megacore OK
            vmem_limit_bytes=32 * 1024 * 1024,      # ~6 MiB needed; explicit budget
        ),
    )(x2d, bits1, bits2)

    out_flat = out2d.reshape(-1)
    if n_padded != n:
        out_flat = out_flat[:n]
    return out_flat.reshape(orig_shape).astype(orig_dtype)


if __name__ == "__main__":
    key = jax.random.PRNGKey(0)
    kx, knoise = jax.random.split(key)

    # Example image batch consistent with the module's forward (NCHW float in [0,1]).
    x = jax.random.uniform(kx, (2, 4, 16, 16), dtype=jnp.float32)
    sigma = 0.1

    out = gaussian_noise(x, sigma, knoise)
    out = jax.block_until_ready(out)

    assert out.shape == x.shape and out.dtype == x.dtype
    assert bool(jnp.all(out >= 0.0)) and bool(jnp.all(out <= 1.0))
    # Noise should actually perturb the input (sigma > 0).
    assert bool(jnp.any(jnp.abs(out - x) > 0.0))

    print("KERNEL_OK")
</pallas_src>

<mosaic_0001>
module attributes {stable_mosaic.version = 11 : i64} {
  func.func @_gaussian_noise_kernel(%arg0: i32, %arg1: memref<4x512xf32, #tpu.memory_space<vmem>>, %arg2: memref<4x256xi32, #tpu.memory_space<vmem>>, %arg3: memref<4x256xi32, #tpu.memory_space<vmem>>, %arg4: memref<4x512xf32, #tpu.memory_space<vmem>>) attributes {dimension_semantics = [#tpu.dimension_semantics<parallel>], iteration_bounds = array<i64: 1>, scalar_prefetch = 0 : i64, scratch_operands = 0 : i64, tpu.core_type = #tpu.core_type<tc>, window_params = [{transform_indices = @transform_0, window_bounds = array<i64: 4, 512>}, {transform_indices = @transform_1, window_bounds = array<i64: 4, 256>}, {transform_indices = @transform_2, window_bounds = array<i64: 4, 256>}, {transform_indices = @transform_3, window_bounds = array<i64: 4, 512>}]} {
    %c0 = arith.constant 0 : index
    %c0_0 = arith.constant 0 : index
    %0 = vector.load %arg2[%c0, %c0_0] : memref<4x256xi32, #tpu.memory_space<vmem>>, vector<4x256xi32>
    %c8388607_i32 = arith.constant 8388607 : i32
    %1 = vector.broadcast %c8388607_i32 : i32 to vector<4x256xi32>
    %2 = arith.andi %0, %1 : vector<4x256xi32>
    %3 = arith.sitofp %2 : vector<4x256xi32> to vector<4x256xf32>
    %cst = arith.constant 5.000000e-01 : f32
    %4 = vector.broadcast %cst : f32 to vector<4x256xf32>
    %5 = arith.addf %3, %4 : vector<4x256xf32>
    %cst_1 = arith.constant 1.1920929E-7 : f32
    %6 = vector.broadcast %cst_1 : f32 to vector<4x256xf32>
    %7 = arith.mulf %5, %6 : vector<4x256xf32>
    %c0_2 = arith.constant 0 : index
    %c0_3 = arith.constant 0 : index
    %8 = vector.load %arg3[%c0_2, %c0_3] : memref<4x256xi32, #tpu.memory_space<vmem>>, vector<4x256xi32>
    %c8388607_i32_4 = arith.constant 8388607 : i32
    %9 = vector.broadcast %c8388607_i32_4 : i32 to vector<4x256xi32>
    %10 = arith.andi %8, %9 : vector<4x256xi32>
    %11 = arith.sitofp %10 : vector<4x256xi32> to vector<4x256xf32>
    %cst_5 = arith.constant 5.000000e-01 : f32
    %12 = vector.broadcast %cst_5 : f32 to vector<4x256xf32>
    %13 = arith.addf %11, %12 : vector<4x256xf32>
    %cst_6 = arith.constant 1.1920929E-7 : f32
    %14 = vector.broadcast %cst_6 : f32 to vector<4x256xf32>
    %15 = arith.mulf %13, %14 : vector<4x256xf32>
    %16 = math.log %7 : vector<4x256xf32>
    %cst_7 = arith.constant -2.000000e+00 : f32
    %17 = vector.broadcast %cst_7 : f32 to vector<4x256xf32>
    %18 = arith.mulf %17, %16 : vector<4x256xf32>
    %19 = math.sqrt %18 : vector<4x256xf32>
    %cst_8 = arith.constant 6.28318548 : f32
    %20 = vector.broadcast %cst_8 : f32 to vector<4x256xf32>
    %21 = arith.mulf %20, %15 : vector<4x256xf32>
    %22 = math.cos %21 : vector<4x256xf32>
    %23 = arith.mulf %19, %22 : vector<4x256xf32>
    %24 = math.sin %21 : vector<4x256xf32>
    %25 = arith.mulf %19, %24 : vector<4x256xf32>
    %26 = tpu.concatenate %23, %25 in 1 : vector<4x256xf32>, vector<4x256xf32> -> vector<4x512xf32>
    %c0_9 = arith.constant 0 : index
    %c0_10 = arith.constant 0 : index
    %27 = vector.load %arg1[%c0_9, %c0_10] : memref<4x512xf32, #tpu.memory_space<vmem>>, vector<4x512xf32>
    %cst_11 = arith.constant 1.000000e-01 : f32
    %28 = vector.broadcast %cst_11 : f32 to vector<4x512xf32>
    %29 = arith.mulf %28, %26 : vector<4x512xf32>
    %30 = arith.addf %27, %29 : vector<4x512xf32>
    %cst_12 = arith.constant 0.000000e+00 : f32
    %cst_13 = arith.constant 1.000000e+00 : f32
    %31 = vector.broadcast %cst_12 : f32 to vector<4x512xf32>
    %32 = arith.maximumf %31, %30 : vector<4x512xf32>
    %33 = vector.broadcast %cst_13 : f32 to vector<4x512xf32>
    %34 = arith.minimumf %33, %32 : vector<4x512xf32>
    %c0_14 = arith.constant 0 : index
    %c0_15 = arith.constant 0 : index
    %35 = vector.load %arg4[%c0_14, %c0_15] : memref<4x512xf32, #tpu.memory_space<vmem>>, vector<4x512xf32>
    tpu.vector_store %arg4[%c0_14, %c0_15], %34 {strides = array<i32>} : memref<4x512xf32, #tpu.memory_space<vmem>>, vector<4x512xf32>,
    return
  }
  func.func @transform_0(%arg0: i32) -> (i32, i32) {
    %c0_i32 = arith.constant 0 : i32
    %c0_i32_0 = arith.constant 0 : i32
    return %arg0, %c0_i32 : i32, i32
  }
  func.func @transform_1(%arg0: i32) -> (i32, i32) {
    %c0_i32 = arith.constant 0 : i32
    %c0_i32_0 = arith.constant 0 : i32
    return %arg0, %c0_i32 : i32, i32
  }
  func.func @transform_2(%arg0: i32) -> (i32, i32) {
    %c0_i32 = arith.constant 0 : i32
    %c0_i32_0 = arith.constant 0 : i32
    return %arg0, %c0_i32 : i32, i32
  }
  func.func @transform_3(%arg0: i32) -> (i32, i32) {
    %c0_i32 = arith.constant 0 : i32
    %c0_i32_0 = arith.constant 0 : i32
    return %arg0, %c0_i32 : i32, i32
  }
}

</mosaic_0001>

<bundles_post_ra>
// kernel: tpu_custom_call.1
= control target key start
LH: loop header
LB: loop body
LE: loop exit
PB: predicated region body
PF: predicated region fallthrough
CT: control target
= control target key end

     0   :  { %8 = vsyncpa [#allocation3], 0  ;;  %s550_s0 = inlined_call_operand.hbm [shape: f32[4,512], index: 0, kind: input, shape index: {}]   ;;  %s551_s1 = inlined_call_operand.hbm [shape: s32[4,256], index: 1, kind: input, shape index: {}]   ;;  %s552_s2 = inlined_call_operand.hbm [shape: s32[4,256], index: 2, kind: input, shape index: {}]   ;;  %s553_s3 = inlined_call_operand.hbm [shape: f32[4,512], index: 3, kind: output, shape index: {}]  }
   0x1   :  { %9 = vsyncpa [#allocation6], 0 }
   0x2   :  { %10 = vsyncpa [#allocation4], 0  ;;  %s448_s12 = smov [#allocation5]   ;;  %s449_s14 = smov [#allocation2]  }
   0x3   :  { %s27_s13 = sshll.u32 %s448_s12, 4  ;;  %s17_s15 = sshll.u32 %s449_s14, 4  ;;  %s28_s13 = int_to_ptr.vmem [resolvable:$true] %s27_s13  ;;  %s18_s15 = int_to_ptr.vmem [resolvable:$true] %s17_s15 }
   0x4   :  { %s354_s18 = scalar_lea.hbm %s551_s1, 128 }
   0x5   :  { %p355_p0 = scmp.ne.s32.totalorder %s551_s1, %s354_s18  ;;  %p358_p1 = scmp.lt.u32.totalorder %s354_s18, %s551_s1 }
   0x7   :  { %p360_p2 = pnand %p358_p1, %p355_p0 }
   0x9   :  { %363 = shalt.err (!%p360_p2)
}
   0xa   :  { %s364_s23 = scalar_lea.vmem %s28_s13, 128  ;;  %p369_p4 = scmp.lt.s32.totalorder %s28_s13, %s28_s13 }
   0xb   :  { %p365_p3 = scmp.ne.s32.totalorder %s28_s13, %s364_s23  ;;  %p370_p5 = scmp.lt.s32.totalorder %s364_s23, %s364_s23 }
   0xd   :  { %p371_p6 = por %p370_p5, %p369_p4 }
   0xf   :  { %p372_p7 = pnand %p371_p6, %p365_p3 }
  0x11   :  { %375 = shalt.err (!%p372_p7)
}
  0x12   :  { %30 = dma.hbm_to_vmem [thread:$0]  %s551_s1, 128, %s28_s13, [#allocation6]  }
  0x13   :  { %s376_s28 = scalar_lea.hbm %s550_s0, 256 }
  0x14   :  { %p377_p8 = scmp.ne.s32.totalorder %s550_s0, %s376_s28  ;;  %p380_p9 = scmp.lt.u32.totalorder %s376_s28, %s550_s0 }
  0x16   :  { %p382_p10 = pnand %p380_p9, %p377_p8 }
  0x18   :  { %385 = shalt.err (!%p382_p10)
}
  0x19   :  { %s386_s6 = scalar_lea.vmem %s18_s15, 256  ;;  %p391_p12 = scmp.lt.s32.totalorder %s18_s15, %s18_s15 }
  0x1a   :  { %p387_p11 = scmp.ne.s32.totalorder %s18_s15, %s386_s6  ;;  %p392_p13 = scmp.lt.s32.totalorder %s386_s6, %s386_s6 }
  0x1c   :  { %p393_p0 = por %p392_p13, %p391_p12 }
  0x1e   :  { %p394_p1 = pnand %p393_p0, %p387_p11 }
  0x20   :  { %397 = shalt.err (!%p394_p1)
}
  0x21   :  { %20 = dma.hbm_to_vmem [thread:$0]  %s550_s0, 256, %s18_s15, [#allocation3]  }
  0x22   :  { %s450_s8 = smov [#allocation7]   ;;  %s398_s12 = scalar_lea.hbm %s552_s2, 128 }
  0x23   :  { %s37_s9 = sshll.u32 %s450_s8, 4  ;;  %p399_p2 = scmp.ne.s32.totalorder %s552_s2, %s398_s12  ;;  %s38_s9 = int_to_ptr.vmem [resolvable:$true] %s37_s9 }
  0x24   :  { %p402_p3 = scmp.lt.u32.totalorder %s398_s12, %s552_s2 }
  0x26   :  { %p404_p4 = pnand %p402_p3, %p399_p2 }
  0x28   :  { %407 = shalt.err (!%p404_p4)
}
  0x29   :  { %s408_s18 = scalar_lea.vmem %s38_s9, 128  ;;  %p413_p6 = scmp.lt.s32.totalorder %s38_s9, %s38_s9 }
  0x2a   :  { %p409_p5 = scmp.ne.s32.totalorder %s38_s9, %s408_s18  ;;  %p414_p7 = scmp.lt.s32.totalorder %s408_s18, %s408_s18 }
  0x2c   :  { %p415_p8 = por %p414_p7, %p413_p6 }
  0x2e   :  { %p416_p9 = pnand %p415_p8, %p409_p5 }
  0x30   :  { %419 = shalt.err (!%p416_p9)
}
  0x31   :  { %40 = dma.hbm_to_vmem [thread:$0]  %s552_s2, 128, %s38_s9, [#allocation6]  }
  0x32   :  { %442 = dma.done.wait [#allocation3], 256  }
  0x33   :  { %443 = vsyncadd [#allocation3], 4294967040 }
  0x34   :  { %444 = dma.done.wait [#allocation6], 256  }
  0x35   :  { %445 = vsyncadd [#allocation6], 4294967040  ;;  %v55_v0 = vld [vmem:[#allocation7] sm:$0xff]  ;;  %v451_v17 = vmov 683565275   ;;  %v50_v40 = vld [vmem:[#allocation5] sm:$0xff] }
  0x36   :  { %v56_v1 = vand.u32 8388607, %v55_v0  ;;  %v452_v19 = vmov 2475754826   ;;  %v453_v21 = vmov 2131351028  }
  0x37   :  { %v454_v27 = vmov 2102212464   ;;  %v455_v30 = vmov 920167782   ;;  %v456_v33 = vmov 1326507024  }
  0x38   :  { %v57_v2 = vcvt.s32.f32 %v56_v1  ;;  %v51_v50 = vand.u32 8388607, %v50_v40  ;;  %s457_s2 = smov [#allocation8]  }
  0x39   :  { %s314_s19 = sshll.u32 %s457_s2, 4  ;;  %s315_s19 = int_to_ptr.vmem [resolvable:$true] %s314_s19 }
  0x3a   :  { %v58_v3 = vadd.f32 0.5, %v57_v2  ;;  %v52_v59 = vcvt.s32.f32 %v51_v50  ;;  %s420_s20 = scalar_lea.vmem %s315_s19, 256  ;;  %p425_p11 = scmp.lt.s32.totalorder %s315_s19, %s315_s19 }
  0x3b   :  { %p421_p10 = scmp.ne.s32.totalorder %s315_s19, %s420_s20  ;;  %p426_p12 = scmp.lt.s32.totalorder %s420_s20, %s420_s20 }
  0x3c   :  { %v59_v4 = vmul.f32 1.1920929e-07, %v58_v3  ;;  %v53_v63 = vadd.f32 0.5, %v52_v59 }
  0x3d   :  { %p427_p13 = por %p426_p12, %p425_p11 }
  0x3e   :  { %v514_v5 = vmul.f32 6.2831855, %v59_v4  ;;  %v54_v2 = vmul.f32 1.1920929e-07, %v53_v63 }
  0x3f   :  { %p428_p0 = pnand %p427_p13, %p421_p10 }
  0x40   :  { %v74_v6 = vand.u32 2139095040, %v514_v5  ;;  %v71_v7 = vand.u32 2147483647, %v514_v5  ;;  %346 = vlog2.f32 %v54_v2  ;;  %vm73_vm7 = vcmp.lt.s32.totalorder %v514_v5, 0 }
  0x42   :  { %v75_v8 = vshrl.u32 %v74_v6, 23  ;;  %v78_v10 = vand.u32 8388607, %v71_v7  ;;  %vm72_vm8 = vcmp.le.f32.partialorder %v71_v7, 0.7853982 }
  0x44   :  { %v324_v9 = vadd.s32 4294967169, %v75_v8  ;;  %v79_v12 = vor.u32 8388608, %v78_v10 }
  0x46   :  { %v81_v11 = vadd.s32 1, %v324_v9  ;;  %v119_v23 = vshll.u32 %v79_v12, 8 }
  0x48   :  { %vm82_vm0 = vcmp.gt.s32.totalorder %v81_v11, 0 }
  0x49   :  { %v83_v13 = vsel %vm82_vm0, %v81_v11, 0 }
  0x4a   :  { %v85_v14 = vand.u32 31, %v83_v13  ;;  %v84_v15 = vshrl.u32 %v83_v13, 5  ;;  %v347_v12 = vpop.eup %346 }
  0x4c   :  { %v86_v16 = vsub.s32 32, %v85_v14  ;;  %v88_v18 = vshll.u32 %v451_v17, %v85_v14  ;;  %v91_v20 = vshll.u32 %v452_v19, %v85_v14  ;;  %v94_v22 = vshll.u32 %v453_v21, %v85_v14 }
  0x4d   :  { %v97_v29 = vshll.u32 %v454_v27, %v85_v14  ;;  %v100_v32 = vshll.u32 %v455_v30, %v85_v14  ;;  %vm103_vm1 = vcmp.lt.s32.totalorder %v84_v15, 1  ;;  %vm104_vm2 = vcmp.lt.s32.totalorder %v84_v15, 2 }
  0x4e   :  { %v87_v24 = vshrl.u32 %v451_v17, %v86_v16  ;;  %v89_v25 = vshrl.u32 %v452_v19, %v86_v16  ;;  %v92_v26 = vshrl.u32 %v453_v21, %v86_v16  ;;  %v95_v28 = vshrl.u32 %v454_v27, %v86_v16 }
  0x4f   :  { %v98_v31 = vshrl.u32 %v455_v30, %v86_v16  ;;  %v101_v34 = vshrl.u32 %v456_v33, %v86_v16  ;;  %vm105_vm3 = vcmp.lt.s32.totalorder %v84_v15, 3  ;;  %vm106_vm4 = vcmp.lt.s32.totalorder %v84_v15, 4 }
  0x50   :  { %v90_v35 = vor.u32 %v89_v25, %v88_v18  ;;  %v93_v36 = vor.u32 %v92_v26, %v91_v20  ;;  %v96_v37 = vor.u32 %v95_v28, %v94_v22  ;;  %v61_v17 = vmul.f32 0.6931472, %v347_v12 }
  0x51   :  { %v99_v38 = vor.u32 %v98_v31, %v97_v29  ;;  %v102_v39 = vor.u32 %v101_v34, %v100_v32 }
  0x52   :  { %v107_v41 = vsel %vm103_vm1, %v87_v24, %v90_v35  ;;  %v111_v42 = vsel %vm103_vm1, %v90_v35, %v93_v36  ;;  %v115_v43 = vsel %vm103_vm1, %v93_v36, %v96_v37  ;;  %v108_v44 = vsel %vm106_vm4, %v96_v37, 2102212464 }
  0x53   :  { %v112_v45 = vsel %vm106_vm4, %v99_v38, 920167782  ;;  %v116_v46 = vsel %vm106_vm4, %v102_v39, 1326507024  ;;  %v109_v47 = vsel %vm105_vm3, %v93_v36, %v108_v44  ;;  %v62_v22 = vmul.f32 -2.0, %v61_v17 }
  0x54   :  { %v113_v48 = vsel %vm105_vm3, %v96_v37, %v112_v45  ;;  %v117_v49 = vsel %vm105_vm3, %v99_v38, %v116_v46  ;;  %v110_v51 = vsel %vm104_vm2, %v107_v41, %v109_v47  ;;  %vm163_vm1 = vweird.f32 %v514_v5 }
  0x55   :  { %v114_v52 = vsel %vm104_vm2, %v111_v42, %v113_v48  ;;  %v118_v53 = vsel %vm104_vm2, %v115_v43, %v117_v49  ;;  %v126_v58 = vmul.u32 %v119_v23, %v110_v51  ;;  %348 = vrsqrt.f32 %v62_v22 }
  0x56   :  { %v523_v54 = vmul.u32.u64.low %v119_v23, %v118_v53  ;;  %v524_v55 = vmul.u32.u64.high %v119_v23, %v118_v53, %v523_v54  ;;  %v526_v56 = vmul.u32.u64.low %v119_v23, %v114_v52  ;;  %v527_v57 = vmul.u32.u64.high %v119_v23, %v114_v52, %v526_v56 }
  0x57   :  { %vm65_vm9 = vcmp.eq.f32.partialorder %v62_v22, inf  ;;  %vm67_vm10 = vcmp.eq.f32.partialorder %v62_v22, 0.0  ;;  %v68_v39 = vand.u32 2147483648, %v62_v22 }
  0x58   :  { %vm128_vm5 = vc.u32 %v524_v55, %v526_v56  ;;  %v129_v60 = vadd.s32 1, %v527_v57  ;;  %v127_v11 = vadd.s32 %v526_v56, %v524_v55 }
  0x5a   :  { %v130_v61 = vsel %vm128_vm5, %v129_v60, %v527_v57  ;;  %v286_v60 = vld [vmem:[#allocation2] sm:$0xff] }
  0x5b   :  { %v131_v62 = vadd.s32 %v130_v61, %v126_v58  ;;  %v287_v61 = vld [vmem:[#allocation2 + $0x8] sm:$0xff] }
  0x5d   :  { %v132_v0 = vadd.s32 536870912, %v131_v62 }
  0x5f   :  { %v133_v1 = vshrl.u32 %v132_v0, 30  ;;  %v349_v34 = vpop.eup %348 }
  0x60   :  { %v64_v37 = vmul.f32 %v349_v34, %v62_v22 }
  0x61   :  { %v134_v3 = vshll.u32 %v133_v1, 30  ;;  %v157_v26 = vsub.s32 4, %v133_v1 }
  0x62   :  { %v66_v40 = vsel %vm65_vm9, %v62_v22, %v64_v37 }
  0x63   :  { %v135_v4 = vsub.s32 %v131_v62, %v134_v3  ;;  %v158_v29 = vsel %vm73_vm7, %v157_v26, %v133_v1  ;;  %v69_v45 = vsel %vm67_vm10, %v68_v39, %v66_v40 }
  0x64   :  { %v160_v32 = vsel %vm72_vm8, 0, %v158_v29 }
  0x65   :  { %v137_v6 = vsub.s32 0, %v135_v4  ;;  %v268_v33 = vadd.s32 3, %v160_v32  ;;  %v164_v35 = vand.u32 3, %v160_v32 }
  0x67   :  { %v325_v8 = vmin.u32 %v137_v6, %v135_v4  ;;  %v269_v36 = vand.u32 3, %v268_v33  ;;  %vm169_vm11 = vcmp.eq.s32.totalorder %v164_v35, 2  ;;  %vm166_vm13 = vcmp.eq.s32.totalorder %v164_v35, 0 }
  0x68   :  { %vm165_vm15 = vcmp.lt.s32.totalorder %v164_v35, 2 }
  0x69   :  { %v139_v9 = vclz %v325_v8  ;;  %vm274_vm12 = vcmp.eq.s32.totalorder %v269_v36, 2  ;;  %vm271_vm14 = vcmp.eq.s32.totalorder %v269_v36, 0  ;;  %vm270_vm0 = vcmp.lt.s32.totalorder %v269_v36, 2 }
  0x6b   :  { %v326_v10 = vadd.s32 4294967294, %v139_v9 }
  0x6d   :  { %vm327_vm6 = vcmp.lt.s32.totalorder %v326_v10, 0 }
  0x6e   :  { %v142_v13 = vsel %vm327_vm6, 0, %v326_v10 }
  0x6f   :  { %v143_v14 = vsub.s32 32, %v142_v13  ;;  %v144_v15 = vshll.u32 %v135_v4, %v142_v13  ;;  %v147_v16 = vsub.s32 4294967266, %v142_v13 }
  0x71   :  { %v145_v18 = vshrl.u32 %v127_v11, %v143_v14  ;;  %v148_v19 = vadd.s32 127, %v147_v16 }
  0x73   :  { %v146_v20 = vor.u32 %v145_v18, %v144_v15  ;;  %v149_v21 = vshll.u32 %v148_v19, 23 }
  0x75   :  { %v150_v23 = vor.u32 4788187, %v149_v21  ;;  %v153_v24 = vcvt.s32.f32 %v146_v20 }
  0x77   :  { %v151_v25 = vand.u32 2147483647, %v150_v23 }
  0x79   :  { %v154_v27 = vmul.f32 %v153_v24, %v151_v25 }
  0x7b   :  { %v155_v28 = vxor.u32 2147483648, %v154_v27 }
  0x7d   :  { %v156_v30 = vsel %vm73_vm7, %v155_v28, %v154_v27 }
  0x7e   :  { %v159_v31 = vsel %vm72_vm8, %v514_v5, %v156_v30 }
  0x7f   :  { %350 = vcosq.f32 %v159_v31 }
  0x80   :  { %352 = vsinq.f32 %v159_v31 }
  0x89   :  { %v351_v38 = vpop.eup %350 }
  0x8a   :  { %v353_v7 = vpop.eup %352  ;;  %v170_v41 = vxor.u32 2147483648, %v351_v38 }
  0x8b   :  { %v167_v42 = vxor.u32 2147483648, %v353_v7 }
  0x8c   :  { %v171_v43 = vsel %vm169_vm11, %v170_v41, %v353_v7  ;;  %v276_v44 = vsel %vm274_vm12, %v170_v41, %v353_v7 }
  0x8d   :  { %v168_v46 = vsel %vm166_vm13, %v351_v38, %v167_v42  ;;  %v273_v47 = vsel %vm271_vm14, %v351_v38, %v167_v42 }
  0x8e   :  { %v172_v48 = vsel %vm165_vm15, %v168_v46, %v171_v43  ;;  %v277_v49 = vsel %vm270_vm0, %v273_v47, %v276_v44 }
  0x8f   :  { %v173_v50 = vsel %vm163_vm1, nan, %v172_v48  ;;  %v278_v51 = vsel %vm163_vm1, nan, %v277_v49 }
  0x90   :  { %v174_v52 = vmul.f32 %v173_v50, %v69_v45  ;;  %v279_v53 = vmul.f32 %v278_v51, %v69_v45 }
  0x92   :  { %v281_v54 = vcombine.high %v174_v52, %v174_v52  ;;  %v288_v55 = vmul.f32 0.1, %v174_v52  ;;  %v284_v56 = vcombine.high %v279_v53, %v279_v53  ;;  %v290_v57 = vmul.f32 0.1, %v279_v53 }
  0x94   :  { %v289_v58 = vmul.f32 0.1, %v281_v54  ;;  %v291_v59 = vmul.f32 0.1, %v284_v56 }
  0x96   :  { %v296_v5 = vcombine.low %v288_v55, %v289_v58  ;;  %v297_v62 = vcombine.low %v290_v57, %v291_v59 }
  0x98   :  { %v300_v63 = vadd.f32 %v296_v5, %v286_v60  ;;  %v301_v0 = vadd.f32 %v297_v62, %v287_v61 }
  0x9a   :  { %v302_v1 = vmax.f32 %v300_v63, 0.0  ;;  %v303_v2 = vmax.f32 %v301_v0, 0.0 }
  0x9c   :  { %v304_v3 = vmin.f32 %v302_v1, 1.0  ;;  %v305_v4 = vmin.f32 %v303_v2, 1.0 }
  0x9e   :  { %306 = vst [vmem:[#allocation8] sm:$0xff] %v304_v3  ;;  %307 = vst [vmem:[#allocation8 + $0x8] sm:$0xff] %v305_v4 }
  0x9f   :  { %431 = shalt.err (!%p428_p0)
}
  0xa0   :  { %s432_s23 = scalar_lea.hbm %s553_s3, 256 }
  0xa1   :  { %p433_p1 = scmp.ne.s32.totalorder %s553_s3, %s432_s23  ;;  %p436_p2 = scmp.lt.u32.totalorder %s432_s23, %s553_s3 }
  0xa3   :  { %p438_p3 = pnand %p436_p2, %p433_p1 }
  0xa5   :  { %441 = shalt.err (!%p438_p3)
}
  0xa6   :  { %317 = dma.vmem_to_hbm [thread:$0]  %s315_s19, 256, %s553_s3, [#allocation4]  }
  0xa7   :  { %446 = dma.done.wait [#allocation4], 256  }
  0xa8   :  { %447 = vsyncadd [#allocation4], 4294967040 }
  0xa9   :  { %321 = vsyncpa [#allocation3], 1 }
  0xaa   :  { %322 = vsyncpa [#allocation6], 1 }
  0xab   :  { %323 = vsyncpa [#allocation4], 1 }

</bundles_post_ra>
